<compile_context>
chip_gen: v7x
topology: tpu7x:2x2x1
jax: 0.10.0
libtpu: 0.0.40
codegen_flags: <defaults>
</compile_context>

<pallas_src>
import math
import functools

import jax
import jax.numpy as jnp
from jax.experimental import pallas as pl
from jax.experimental.pallas import tpu as pltpu


_NEG_INF = -1e30          # finite mask value (avoids inf-inf -> NaN)


@functools.lru_cache(maxsize=1)
def _vmem_limit_bytes():
    """Generation-aware VMEM limit: physical capacity minus ~16 MiB headroom."""
    default = 48 * 1024 * 1024                     # safe on v7x (64 MiB physical)
    try:
        cap = int(getattr(pltpu.get_tpu_info(), "vmem_capacity_bytes", 0))
    except Exception:
        cap = 0
    if cap <= 0:
        return default
    return max(32 * 1024 * 1024, cap - 16 * 1024 * 1024)


def _largest_divisor_tile(n, cap, mult):
    """Largest divisor of n that is a multiple of `mult` and <= cap; else n."""
    best = 0
    d = mult
    lim = min(n, cap)
    while d <= lim:
        if n % d == 0:
            best = d
        d += mult
    return best if best else n


# ---------------------------------------------------------------------------
# Linear projection kernel:  out = x @ W_t + b   (bf16 MXU inputs, f32 acc)
# ---------------------------------------------------------------------------
def _linear_kernel(x_ref, w_ref, b_ref, o_ref):
    # x_ref: (1, tr, Cin) bf16   w_ref: (Cin, tn) bf16   b_ref: (1, tn) f32
    acc = jnp.dot(x_ref[0], w_ref[...], preferred_element_type=jnp.float32)
    o_ref[0] = (acc + b_ref[0]).astype(o_ref.dtype)


def _linear(x_bf16, w_t_bf16, b_f32, out_dtype):
    B, T, Cin = x_bf16.shape
    Cout = w_t_bf16.shape[1]
    tr = _largest_divisor_tile(T, 512, 16)          # row tile
    tn = _largest_divisor_tile(Cout, 1024, 128)     # Cout tile (keeps weight in VMEM bounds)
    b2 = b_f32.reshape(1, Cout)
    return pl.pallas_call(
        _linear_kernel,
        out_shape=jax.ShapeDtypeStruct((B, T, Cout), out_dtype),
        grid_spec=pltpu.PrefetchScalarGridSpec(
            num_scalar_prefetch=0,
            grid=(B, T // tr, Cout // tn),
            in_specs=[
                pl.BlockSpec((1, tr, Cin), lambda b, i, j: (b, i, 0)),
                pl.BlockSpec((Cin, tn), lambda b, i, j: (0, j)),
                pl.BlockSpec((1, tn), lambda b, i, j: (0, j)),
            ],
            out_specs=pl.BlockSpec((1, tr, tn), lambda b, i, j: (b, i, j)),
        ),
        compiler_params=pltpu.CompilerParams(
            dimension_semantics=("parallel", "parallel", "parallel"),
            vmem_limit_bytes=_vmem_limit_bytes()),
    )(x_bf16, w_t_bf16, b2)


# ---------------------------------------------------------------------------
# Flash attention kernel on the fused (B, T, 3C) layout.
# Grid: (B, head_groups, q_blocks, kv_blocks); g heads packed per block.
# ---------------------------------------------------------------------------
def _flash_kernel(q_ref, k_ref, v_ref, o_ref, m_ref, l_ref, acc_ref, *,
                  tq, tk, g, hd):
    qi = pl.program_id(2)
    ki = pl.program_id(3)
    q_start = qi * tq
    kv_start = ki * tk

    @pl.when(ki == 0)
    def _init():
        m_ref[...] = jnp.full(m_ref.shape, _NEG_INF, m_ref.dtype)
        l_ref[...] = jnp.zeros(l_ref.shape, l_ref.dtype)
        acc_ref[...] = jnp.zeros(acc_ref.shape, acc_ref.dtype)

    def _update(masked):
        # Unrolled over the g heads packed in this lane-dense block.
        for h in range(g):
            lo, hi = h * hd, (h + 1) * hd
            q = q_ref[0, :, lo:hi]                       # (tq, hd) bf16 (scale pre-folded)
            k = k_ref[0, :, lo:hi]                       # (tk, hd) bf16
            s = jax.lax.dot_general(
                q, k, (((1,), (1,)), ((), ())),
                preferred_element_type=jnp.float32)      # (tq, tk) f32
            if masked:
                row = q_start + jax.lax.broadcasted_iota(jnp.int32, (tq, tk), 0)
                col = kv_start + jax.lax.broadcasted_iota(jnp.int32, (tq, tk), 1)
                s = jnp.where(row >= col, s, _NEG_INF)
            m_prev = m_ref[h]
            m_new = jnp.maximum(m_prev, jnp.max(s, axis=-1, keepdims=True))
            alpha = jnp.exp(m_prev - m_new)
            p = jnp.exp(s - m_new)
            l_ref[h] = alpha * l_ref[h] + jnp.sum(p, axis=-1, keepdims=True)
            acc_ref[h] = alpha * acc_ref[h] + jnp.dot(
                p.astype(jnp.bfloat16), v_ref[0, :, lo:hi],
                preferred_element_type=jnp.float32)
            m_ref[h] = m_new

    # Fully below / on the diagonal: no mask needed (saves iota+cmp+select).
    @pl.when(kv_start + (tk - 1) <= q_start)
    def _unmasked():
        _update(masked=False)

    # Straddling the diagonal (but not fully above): apply the causal mask.
    @pl.when(jnp.logical_and(kv_start + (tk - 1) > q_start,
                             kv_start <= q_start + (tq - 1)))
    def _masked():
        _update(masked=True)

    # Fully-above-diagonal blocks: no compute and (via the clamped K/V
    # index_map) no new DMA either — the resident block is just revisited.

    @pl.when(ki == pl.num_programs(3) - 1)
    def _finalize():
        for h in range(g):
            inv_l = pl.reciprocal(l_ref[h], approx=True)
            o_ref[0, :, h * hd:(h + 1) * hd] = (acc_ref[h] * inv_l).astype(o_ref.dtype)


def _flash_attention(qkv_bf16, *, n_head, head_dim, out_dtype):
    B, T, three_c = qkv_bf16.shape
    C = three_c // 3
    hd = head_dim
    H = n_head

    # Pack heads so every block (and the output store) is >=128 lanes wide.
    g = 1 if hd % 128 == 0 else 128 // math.gcd(hd, 128)
    if H % g != 0:
        # TODO(synk): fall back to a per-head (B,H,T,hd) layout for head dims
        # that cannot be packed into 128-lane-aligned blocks.
        raise NotImplementedError(
            f"head_dim={hd} with n_head={H} cannot be packed to 128-lane blocks")
    G = H // g                                   # number of head groups
    bw = g * hd                                  # block width (multiple of 128)

    tq = _largest_divisor_tile(T, 256, 16)
    tk = _largest_divisor_tile(T, 512, 16)

    def q_map(b, p, i, j):
        return (b, i, p)

    def kv_map(base):
        def m(b, p, i, j):
            # Clamp to the last kv block needed for this q block (causal):
            # skipped (above-diagonal) steps reuse the already-resident block.
            last = (i * tq + (tq - 1)) // tk
            return (b, jnp.minimum(j, last), base + p)
        return m

    kernel = functools.partial(_flash_kernel, tq=tq, tk=tk, g=g, hd=hd)
    return pl.pallas_call(
        kernel,
        out_shape=jax.ShapeDtypeStruct((B, T, C), out_dtype),
        grid_spec=pltpu.PrefetchScalarGridSpec(
            num_scalar_prefetch=0,
            grid=(B, G, T // tq, T // tk),
            in_specs=[
                pl.BlockSpec((1, tq, bw), q_map),
                pl.BlockSpec((1, tk, bw), kv_map(G)),
                pl.BlockSpec((1, tk, bw), kv_map(2 * G)),
            ],
            out_specs=pl.BlockSpec((1, tq, bw), lambda b, p, i, j: (b, i, p)),
            scratch_shapes=[
                pltpu.VMEM((g, tq, 1), jnp.float32),     # running max m (per head)
                pltpu.VMEM((g, tq, 1), jnp.float32),     # running denom l (per head)
                pltpu.VMEM((g, tq, hd), jnp.float32),    # output accumulator
            ],
        ),
        compiler_params=pltpu.CompilerParams(
            dimension_semantics=("parallel", "parallel", "parallel", "arbitrary"),
            vmem_limit_bytes=_vmem_limit_bytes()),
    )(qkv_bf16, qkv_bf16, qkv_bf16)


# ---------------------------------------------------------------------------
# Full module forward
# ---------------------------------------------------------------------------
def causal_self_attention(x, w_attn, b_attn, w_proj, b_proj, *, n_head):
    """Forward of CausalSelfAttention (dropout = identity / eval mode).

    x:       (B, T, C) float32
    w_attn:  (3C, C)  c_attn.weight (PyTorch out,in)     b_attn: (3C,)
    w_proj:  (C, C)   c_proj.weight                      b_proj: (C,)
    """
    x = jnp.asarray(x)
    B, T, C = x.shape
    assert C % n_head == 0
    hd = C // n_head
    scale = 1.0 / math.sqrt(hd)

    # Pre-transpose weights to input-major; fold 1/sqrt(hd) into the Q slice.
    w_qkv_t = jnp.asarray(w_attn, jnp.float32).T           # (C, 3C)
    w_qkv_t = w_qkv_t.at[:, :C].multiply(scale)
    b_qkv = jnp.asarray(b_attn, jnp.float32).at[:C].multiply(scale)
    w_proj_t = jnp.asarray(w_proj, jnp.float32).T          # (C, C)
    b_proj = jnp.asarray(b_proj, jnp.float32)

    x_bf = x.astype(jnp.bfloat16)                          # cast once, in the wrapper

    # --- QKV projection -> fused (B, T, 3C) bf16 (flash consumes it directly) ---
    qkv = _linear(x_bf, w_qkv_t.astype(jnp.bfloat16), b_qkv, out_dtype=jnp.bfloat16)

    # --- Flash attention straight on the fused layout -> (B, T, C) bf16 ---
    y = _flash_attention(qkv, n_head=n_head, head_dim=hd, out_dtype=jnp.bfloat16)

    # --- Output projection (final result back in x.dtype) ---
    # TODO(synk): attn_dropout / resid_dropout are identity (inference); no kernel.
    return _linear(y, w_proj_t.astype(jnp.bfloat16), b_proj, out_dtype=x.dtype)


# ---------------------------------------------------------------------------
# Pure-JAX reference matching the PyTorch forward (dropout = identity)
# ---------------------------------------------------------------------------
def _reference(x, w_attn, b_attn, w_proj, b_proj, n_head):
    B, T, C = x.shape
    hd = C // n_head
    qkv = jnp.einsum('btc,oc->bto', x, w_attn) + b_attn
    q, k, v = jnp.split(qkv, 3, axis=-1)

    def heads(t):
        return t.reshape(B, T, n_head, hd).transpose(0, 2, 1, 3)

    q, k, v = heads(q), heads(k), heads(v)
    att = jnp.einsum('bhqd,bhkd->bhqk', q, k) / math.sqrt(hd)
    mask = jnp.tril(jnp.ones((T, T), dtype=bool))
    att = jnp.where(mask[None, None], att, -jnp.inf)
    att = jax.nn.softmax(att, axis=-1)
    y = jnp.einsum('bhqk,bhkd->bhqd', att, v)
    y = y.transpose(0, 2, 1, 3).reshape(B, T, C)
    return jnp.einsum('btc,oc->bto', y, w_proj) + b_proj


if __name__ == "__main__":
    def run_case(B, T, C, n_head, seed):
        key = jax.random.PRNGKey(seed)
        kx, kw1, kb1, kw2, kb2 = jax.random.split(key, 5)
        x = jax.random.normal(kx, (B, T, C), dtype=jnp.float32)
        bound = 1.0 / math.sqrt(C)
        w_attn = jax.random.uniform(kw1, (3 * C, C), jnp.float32, -bound, bound)
        b_attn = jax.random.uniform(kb1, (3 * C,), jnp.float32, -bound, bound)
        w_proj = jax.random.uniform(kw2, (C, C), jnp.float32, -bound, bound)
        b_proj = jax.random.uniform(kb2, (C,), jnp.float32, -bound, bound)

        out = causal_self_attention(x, w_attn, b_attn, w_proj, b_proj,
                                    n_head=n_head)
        out = jax.block_until_ready(out)
        ref = _reference(x, w_attn, b_attn, w_proj, b_proj, n_head)
        assert out.shape == (B, T, C)
        err = float(jnp.max(jnp.abs(out - ref)))
        # bf16 MXU inputs + bf16 intermediates + approx reciprocal -> relaxed tol
        assert jnp.allclose(out, ref, atol=4e-2, rtol=4e-2), \
            f"mismatch vs reference (max abs err {err})"

    # hd=64 -> 2 heads packed per flash block (128-lane dense), single q/kv block.
    run_case(B=2, T=128, C=128, n_head=2, seed=0)
    # hd=128 -> 1 head per block, two head groups.
    run_case(B=2, T=256, C=256, n_head=2, seed=1)
    # Larger T: exercises causal block skipping, K/V index clamping and the
    # unmasked below-diagonal path (tq=256, tk=512).
    run_case(B=1, T=1024, C=128, n_head=2, seed=2)

    print("KERNEL_OK")
</pallas_src>

<mosaic_0001>
module attributes {stable_mosaic.version = 11 : i64} {
  func.func @_linear_kernel(%arg0: i32, %arg1: i32, %arg2: i32, %arg3: memref<1x128x128xbf16, #tpu.memory_space<vmem>>, %arg4: memref<128x384xbf16, #tpu.memory_space<vmem>>, %arg5: memref<1x384xf32, #tpu.memory_space<vmem>>, %arg6: memref<1x128x384xbf16, #tpu.memory_space<vmem>>) attributes {dimension_semantics = [#tpu.dimension_semantics<parallel>, #tpu.dimension_semantics<parallel>, #tpu.dimension_semantics<parallel>], iteration_bounds = array<i64: 2, 1, 1>, scalar_prefetch = 0 : i64, scratch_operands = 0 : i64, tpu.core_type = #tpu.core_type<tc>, window_params = [{transform_indices = @transform_0, window_bounds = array<i64: 1, 128, 128>}, {transform_indices = @transform_1, window_bounds = array<i64: 128, 384>}, {transform_indices = @transform_2, window_bounds = array<i64: 1, 384>}, {transform_indices = @transform_3, window_bounds = array<i64: 1, 128, 384>}]} {
    %c0 = arith.constant 0 : index
    %c0_0 = arith.constant 0 : index
    %c0_1 = arith.constant 0 : index
    %0 = vector.load %arg3[%c0, %c0_0, %c0_1] : memref<1x128x128xbf16, #tpu.memory_space<vmem>>, vector<1x128x128xbf16>
    %1 = vector.shape_cast %0 : vector<1x128x128xbf16> to vector<128x128xbf16>
    %c0_2 = arith.constant 0 : index
    %c0_3 = arith.constant 0 : index
    %2 = vector.load %arg4[%c0_2, %c0_3] : memref<128x384xbf16, #tpu.memory_space<vmem>>, vector<128x384xbf16>
    %cst = arith.constant dense<0.000000e+00> : vector<128x384xf32>
    %3 = tpu.matmul %1, %2, %cst {dimension_numbers = #tpu.dot_dimension_numbers<[1], [0], [0], [1], [0, 0, 1, 1], [], []>} : vector<128x128xbf16>, vector<128x384xbf16>, vector<128x384xf32> -> vector<128x384xf32>
    %c0_4 = arith.constant 0 : index
    %c0_5 = arith.constant 0 : index
    %4 = vector.load %arg5[%c0_4, %c0_5] : memref<1x384xf32, #tpu.memory_space<vmem>>, vector<1x384xf32>
    %5 = vector.shape_cast %4 : vector<1x384xf32> to vector<384xf32>
    %6 = vector.shape_cast %5 : vector<384xf32> to vector<1x384xf32>
    %7 = vector.broadcast %6 : vector<1x384xf32> to vector<128x384xf32>
    %8 = arith.addf %3, %7 : vector<128x384xf32>
    %9 = arith.truncf %8 : vector<128x384xf32> to vector<128x384xbf16>
    %c0_6 = arith.constant 0 : index
    %c0_7 = arith.constant 0 : index
    %c0_8 = arith.constant 0 : index
    %10 = vector.load %arg6[%c0_6, %c0_7, %c0_8] : memref<1x128x384xbf16, #tpu.memory_space<vmem>>, vector<1x128x384xbf16>
    %11 = vector.shape_cast %10 : vector<1x128x384xbf16> to vector<128x384xbf16>
    %12 = vector.shape_cast %9 : vector<128x384xbf16> to vector<1x128x384xbf16>
    tpu.vector_store %arg6[%c0_6, %c0_7, %c0_8], %12 {strides = array<i32>} : memref<1x128x384xbf16, #tpu.memory_space<vmem>>, vector<1x128x384xbf16>,
    return
  }
  func.func @transform_0(%arg0: i32, %arg1: i32, %arg2: i32) -> (i32, i32, i32) {
    %c0_i32 = arith.constant 0 : i32
    %c0_i32_0 = arith.constant 0 : i32
    return %arg0, %arg1, %c0_i32 : i32, i32, i32
  }
  func.func @transform_1(%arg0: i32, %arg1: i32, %arg2: i32) -> (i32, i32) {
    %c0_i32 = arith.constant 0 : i32
    %c0_i32_0 = arith.constant 0 : i32
    return %c0_i32, %arg2 : i32, i32
  }
  func.func @transform_2(%arg0: i32, %arg1: i32, %arg2: i32) -> (i32, i32) {
    %c0_i32 = arith.constant 0 : i32
    %c0_i32_0 = arith.constant 0 : i32
    return %c0_i32, %arg2 : i32, i32
  }
  func.func @transform_3(%arg0: i32, %arg1: i32, %arg2: i32) -> (i32, i32, i32) {
    %c0_i32 = arith.constant 0 : i32
    return %arg0, %arg1, %arg2 : i32, i32, i32
  }
}

</mosaic_0001>

<bundles_post_ra>
// kernel: tpu_custom_call.1
= control target key start
LH: loop header
LB: loop body
LE: loop exit
PB: predicated region body
PF: predicated region fallthrough
CT: control target
= control target key end

     0   :  { %8 = vsyncpa [#allocation3], 0  ;;  %s1829_s0 = inlined_call_operand.hbm [shape: bf16[2,128,128], index: 0, kind: input, shape index: {}]   ;;  %s1830_s1 = inlined_call_operand.hbm [shape: bf16[128,384], index: 1, kind: input, shape index: {}]   ;;  %s1831_s2 = inlined_call_operand.vmem [shape: f32[1,384], index: 2, kind: input, shape index: {}]   ;;  %s1832_s3 = inlined_call_operand.hbm [shape: bf16[2,128,384], index: 3, kind: output, shape index: {}]  }
   0x1   :  { %10 = vsyncpa [#allocation3 + $0x1], 0 }
   0x2   :  { %11 = vsyncpa [#allocation6], 0 }
   0x3   :  { %12 = vsyncpa [#allocation4], 0 }
   0x4   :  { %14 = vsyncpa [#allocation4 + $0x1], 0  ;;  %s1499_s12 = smov 0   ;;  %s1501_s13 = smov 0  }
   0x5   :  { %s1503_s14 = smov 0   ;;  %s1505_s15 = smov 0  }
   0x6   :  { %s1507_s16 = smov 0   ;;  %s1509_s17 = smov 0  }
   0x7 LB: > { %s1041_s18 = sadd.s32 4294967295, %s1467_s17   ;;  %s1042_s19 = sadd.s32 4294967294, %s1467_s17   ;;  %s1467_s17 = sphi %s1509_s17, %s20_s17   ;;  %s1463_s16 = sphi %s1507_s16, %s1856_s16   ;;  %s1459_s15 = sphi %s1505_s15, %s1855_s15   ;;  %s1455_s14 = sphi %s1503_s14, %s1854_s14   ;;  %s1451_s13 = sphi %s1501_s13, %s1853_s13   ;;  %s1447_s12 = sphi %s1499_s12, %s1852_s12  }
   0x8   : > { %p61_p0 = scmp.ne.s32.totalorder %s1451_s13, %s1447_s12  ;;  %p1533_p1 = scmp.eq.s32.totalorder %s1041_s18, 0 }
   0x9   : > { %p1537_p2 = scmp.eq.s32.totalorder %s1041_s18, 1  ;;  %p147_p3 = scmp.eq.s32.totalorder %s1042_s19, 1 }
   0xa   : > { %s1837_s20 = scalar_select %p1533_p1, 1, 0 }
   0xb   : > { %s1838_s21 = scalar_select %p1537_p2, 1, 0 }
   0xc   : > { %p1543_p4 = por %p1533_p1, %p61_p0  ;;  %p1043_p5 = scmp.ge.s32.totalorder %s1467_s17, 1 }
   0xd   : > { %p1548_p6 = por %p147_p3, %p61_p0  ;;  %p154_p7 = scmp.lt.s32.totalorder %s1467_s17, 3 }
   0xe   : > { %s1839_s22 = scalar_select %p1543_p4, 1, 0 }
   0xf   : > { %s1840_s23 = scalar_select %p1548_p6, 1, 0 }
  0x10   : > { %p1553_p8 = pnand %p1043_p5, %p154_p7  ;;  %s1469_s25 = smov [#allocation5]  }
  0x11   : > { %s169_s26 = sshll.u32 %s1469_s25, 4  ;;  %s39_s28 = sadd.s32 1, %s1463_s16  ;;  %s170_s26 = int_to_ptr.vmem [resolvable:$true] %s169_s26 }
  0x12   : > { %s1841_s24 = scalar_select %p1553_p8, 1, 0 }
  0x13   : > { %p1211_p9 = pneg %p1553_p8  ;;  %s1323_s4 = scalar_lea.hbm %s1830_s1, 3072 }
  0x14   : > { %p1324_p12 = scmp.ne.s32.totalorder %s1830_s1, %s1323_s4  ;;  %p1330_p5 = scmp.lt.u32.totalorder %s1323_s4, %s1830_s1 }
  0x15   : > { %p1562_p11 = pnand %p1211_p9, %p1533_p1 }
  0x17   : > { %p1325_p13 = pneg %p1562_p11 }
  0x19   : > { %p1326_p0 = pnand %p1325_p13, %p1324_p12 }
  0x1b   : > { %p1327_p3 = pneg %p1326_p0 }
  0x1d   : > { %p1332_p7 = pnand %p1330_p5, %p1327_p3 }
  0x1f   : > { %1335 = shalt.err (!%p1332_p7)
}
  0x20   : > { %s1336_s9 = scalar_lea.vmem %s170_s26, 3072  ;;  %p1344_p1 = scmp.lt.s32.totalorder %s170_s26, %s170_s26 }
  0x21   : > { %p1337_p9 = scmp.ne.s32.totalorder %s170_s26, %s1336_s9  ;;  %p1345_p4 = scmp.lt.s32.totalorder %s1336_s9, %s1336_s9 }
  0x23   : > { %p1339_p10 = pnand %p1337_p9, %p1325_p13  ;;  %p1346_p8 = por %p1345_p4, %p1344_p1 }
  0x25   : > { %p1340_p6 = pneg %p1339_p10 }
  0x27   : > { %p1347_p2 = pnand %p1346_p8, %p1340_p6 }
  0x29   : > { %1350 = shalt.err (!%p1347_p2)
}
  0x2a   : > { %s1470_s10 = smov 192   ;;  %s1471_s11 = smov 12  }
  0x2b   : > { %1214 = dma.hbm_to_vmem [thread:$0]  (!%p1562_p11), %s1830_s1, 3072, %s170_s26, [#allocation6], %s1470_s10, %s1470_s10, %s1471_s11  }
  0x2c   : > { %p41_p1 = scmp.ge.s32.totalorder %s39_s28, 2  ;;  %s48_s25 = sadd.s32 1, %s1455_s14 }
  0x2d   : > { %p55_p2 = scmp.ne.s32.totalorder %s1455_s14, %s1451_s13  ;;  %p56_p4 = scmp.eq.s32.totalorder %s1467_s17, 0 }
  0x2e   : > { %s1858_s28 = smov (%p41_p1, %s39_s28), 0  ;;  %p1844_p8 = scmp.ne.s32.totalorder %s1838_s21, 0 }
  0x2f   : > { %p1589_p6 = por %p56_p4, %p55_p2  ;;  %s43_s27 = ssub.s32 %s1463_s16, %s1858_s28 }
  0x30   : > { %p1595_p10 = por %p1844_p8, %p55_p2  ;;  %p1224_p12 = scmp.lt.s32.totalorder %s1467_s17, 2 }
  0x31   : > { %p46_p11 = scmp.eq.s32.totalorder %s43_s27, 0  ;;  %s191_s26 = sand.u32 1, %s1455_s14  }
  0x32   : > { %s1047_s4 = sshll.u32 %s191_s26, 6  ;;  %s1120_s6 = sshll.u32 %s1463_s16, 10 }
  0x33   : > { %s1604_s5 = scalar_select %p46_p11, %s1455_s14, %s48_s25  }
  0x34   : > { %s1610_s9 = scalar_lea.hbm %s1829_s0, %s1120_s6  ;;  %s195_s21 = scalar_lea.vmem [#allocation2], %s1047_s4 }
  0x35   : > { %s204_s10 = sshll.u32 %s195_s21, 4  ;;  %p1616_p13 = pnand %p1224_p12, %p1589_p6  ;;  %s1612_s10 = int_to_ptr.vmem [resolvable:$true] %s204_s10 }
  0x36   : > { %s1620_s18 = scalar_lea.sflag [#allocation3], %s191_s26  ;;  %s1351_s19 = scalar_lea.hbm %s1610_s9, 1024 }
  0x37   : > { %p1352_p0 = scmp.ne.s32.totalorder %s1610_s9, %s1351_s19  ;;  %p1353_p3 = pneg %p1616_p13 }
  0x38   : > { %s1356_s29 = scalar_lea.hbm %s1829_s0, 2048  ;;  %p1357_p9 = scmp.lt.u32.totalorder %s1610_s9, %s1829_s0 }
  0x39   : > { %p1354_p5 = pnand %p1353_p3, %p1352_p0  ;;  %p1358_p1 = scmp.lt.u32.totalorder %s1356_s29, %s1351_s19 }
  0x3a   : > { %p1360_p4 = scmp.lt.u32.totalorder %s1351_s19, %s1610_s9 }
  0x3b   : > { %p1355_p7 = pneg %p1354_p5  ;;  %p1359_p2 = por %p1358_p1, %p1357_p9 }
  0x3d   : > { %p1361_p6 = por %p1360_p4, %p1359_p2 }
  0x3f   : > { %p1362_p8 = pnand %p1361_p6, %p1355_p7 }
  0x41   : > { %1365 = shalt.err (!%p1362_p8)
}
  0x42   : > { %s1366_s26 = scalar_lea.vmem %s1612_s10, 1024  ;;  %s1472_s7 = smov [#allocation2]  }
  0x43   : > { %p1367_p12 = scmp.ne.s32.totalorder %s1612_s10, %s1366_s26  ;;  %s1371_s8 = sshll.u32 %s1472_s7, 4  ;;  %s1372_s8 = int_to_ptr.vmem [resolvable:$false] %s1371_s8 }
  0x44   : > { %s1373_s21 = scalar_lea.vmem %s1372_s8, 2048  ;;  %p1374_p5 = scmp.lt.s32.totalorder %s1612_s10, %s1372_s8 }
  0x45   : > { %p1369_p11 = pnand %p1367_p12, %p1353_p3  ;;  %p1375_p9 = scmp.lt.s32.totalorder %s1373_s21, %s1366_s26 }
  0x47   : > { %p1370_p0 = pneg %p1369_p11  ;;  %p1376_p1 = por %p1375_p9, %p1374_p5 }
  0x49   : > { %p1377_p2 = pnand %p1376_p1, %p1370_p0 }
  0x4b   : > { %1380 = shalt.err (!%p1377_p2)
}
  0x4c   : > { %s1473_s19 = smov 64   ;;  %s1474_s25 = smov 4  }
  0x4d   : > { %1218 = dma.hbm_to_vmem [thread:$0]  (!%p1616_p13), %s1610_s9, 1024, %s1612_s10, %s1620_s18, %s1473_s19, %s1473_s19, %s1474_s25  }
  0x4e   : > { %p1847_p3 = scmp.ne.s32.totalorder %s1841_s24, 0 }
  0x4f   : > { %s1651_s27 = sand.u32 (!%p1847_p3), 1, %s1451_s13   ;;  %p1848_p7 = scmp.ne.s32.totalorder (!%p1847_p3), %s1839_s22, 0 }
  0x50   : > { %216 = sbr.rel (%p1847_p3) target bundleno = 414 (0x19e), region = 32  ;;  %s1051_s29 = sshll.u32 (!%p1847_p3), %s1651_s27, 6 }
  0x51   : > { %s219_s4 = scalar_lea.sflag (!%p1847_p3), [#allocation3], %s1651_s27  ;;  %s1655_s6 = scalar_lea.vmem (!%p1847_p3), [#allocation2], %s1051_s29 }
  0x57   : > { %1434 = dma.done.wait (%p1848_p7), %s219_s4, 1024  }
  0x58   : > { %1436 = vsyncadd (%p1848_p7), %s219_s4, 4294966272  ;;  %p1849_p13 = scmp.ne.s32.totalorder %s1837_s20, 0 }
  0x5a   : > { %1438 = dma.done.wait (%p1849_p13), [#allocation6], 3072  }
  0x5b   : > { %1440 = vsyncadd (%p1849_p13), [#allocation6], 4294964224  ;;  %v1475_v0 = vmov 0   ;;  %v1283_v1 = vld [vmem:[#allocation5 + $0x4] ss:$12 sps:$4 sm:$0xff]   ;;  %v1311_v26 = vld [vmem:[%s1655_s6 + $0x8] sm:$0xff]   ;;  %v313_v33 = vlaneseq }
  0x5c   : > { %536 = vmatprep.mubr.bf16.mxu0 %v1475_v0  ;;  %v1285_v2 = vld [vmem:[#allocation5] ss:$12 sps:$4 sm:$0xff]   ;;  %504 = vmatprep.subr.bf16.mxu0 %v1283_v1  ;;  %v1286_v3 = vld [vmem:[#allocation5 + $0x1c] ss:$12 sps:$4 sm:$0xff]   ;;  %v1288_v4 = vld [vmem:[#allocation5 + $0x18] ss:$12 sps:$4 sm:$0xff]  }
  0x5d   : > { %505 = vmatpush1.bf16.msra.mxu0 %v1285_v2  ;;  %v1289_v5 = vld [vmem:[#allocation5 + $0x34] ss:$12 sps:$4 sm:$0xff]   ;;  %v1291_v6 = vld [vmem:[#allocation5 + $0x30] ss:$12 sps:$4 sm:$0xff]   ;;  %v1292_v7 = vld [vmem:[#allocation5 + $0x4c] ss:$12 sps:$4 sm:$0xff]  }
  0x5e   : > { %506 = vmatprep.subr.bf16.mxu0 %v1286_v3  ;;  %v1294_v8 = vld [vmem:[#allocation5 + $0x48] ss:$12 sps:$4 sm:$0xff]   ;;  %v1295_v9 = vld [vmem:[#allocation5 + $0x64] ss:$12 sps:$4 sm:$0xff]   ;;  %v1309_v12 = vld [vmem:[#allocation5 + $0x20] ss:$12 sps:$4 sm:$0xff]  }
  0x5f   : > { %v1307_v10 = vld [vmem:[#allocation5 + $0x8] ss:$12 sps:$4 sm:$0xff]   ;;  %v1308_v11 = vld [vmem:[%s1655_s6] sm:$0xff]   ;;  %v1312_v17 = vld [vmem:[#allocation5 + $0x50] ss:$12 sps:$4 sm:$0xff]   ;;  %v314_v34 = vshrl.u32 %v313_v33, 7 }
  0x60   : > { %1169 = vmatprep.subr.bf16.mxu1 %v1307_v10  ;;  %v1297_v13 = vld [vmem:[#allocation5 + $0x60] ss:$12 sps:$4 sm:$0xff]   ;;  %1185 = vmatprep.mubr.bf16.mxu1 %v1308_v11  ;;  %v1310_v14 = vld [vmem:[#allocation5 + $0x38] ss:$12 sps:$4 sm:$0xff]   ;;  %v1298_v15 = vld [vmem:[#allocation5 + $0x7c] ss:$12 sps:$4 sm:$0xff]  }
  0x61   : > { %507 = vmatpush1.bf16.msra.mxu0 %v1288_v4  ;;  %1170 = vmatpush3.bf16.msra.mxu1 %v1307_v10  ;;  %v1300_v16 = vld [vmem:[#allocation5 + $0x78] ss:$12 sps:$4 sm:$0xff]   ;;  %v1301_v18 = vld [vmem:[#allocation5 + $0x94] ss:$12 sps:$4 sm:$0xff]   ;;  %v1303_v19 = vld [vmem:[#allocation5 + $0x90] ss:$12 sps:$4 sm:$0xff]  }
  0x62   : > { %508 = vmatprep.subr.bf16.mxu0 %v1289_v5  ;;  %1171 = vmatprep.subr.bf16.mxu1 %v1309_v12  ;;  %v1313_v20 = vld [vmem:[#allocation5 + $0x68] ss:$12 sps:$4 sm:$0xff]   ;;  %v1304_v21 = vld [vmem:[#allocation5 + $0xac] ss:$12 sps:$4 sm:$0xff]   ;;  %v1318_v25 = vld [vmem:[#allocation5 + $0xb0] ss:$12 sps:$4 sm:$0xff]  }
  0x63   : > { %v1306_v22 = vld [vmem:[#allocation5 + $0xa8] ss:$12 sps:$4 sm:$0xff]   ;;  %v1315_v23 = vld [vmem:[#allocation5 + $0x80] ss:$12 sps:$4 sm:$0xff]   ;;  %v1316_v24 = vld [vmem:[#allocation5 + $0x98] ss:$12 sps:$4 sm:$0xff]  }
  0x64   : > { %v1314_v27 = vld [vmem:[%s1655_s6 + $0x10] sm:$0xff]   ;;  %v1317_v28 = vld [vmem:[%s1655_s6 + $0x18] sm:$0xff]   ;;  %v1319_v29 = vld [vmem:[%s1655_s6 + $0x20] sm:$0xff]   ;;  %v315_v35 = vsub.s32 0, %v314_v34  ;;  %v319_v37 = vsub.s32 1, %v314_v34  ;;  %s1201_s24 = smul.u32 192, %s1651_s27 }
  0x65   : > { %509 = vmatpush1.bf16.msra.mxu0 %v1291_v6  ;;  %1172 = vmatpush3.bf16.msra.mxu1 %v1309_v12  ;;  %v1320_v30 = vld [vmem:[%s1655_s6 + $0x28] sm:$0xff]   ;;  %v1321_v31 = vld [vmem:[%s1655_s6 + $0x30] sm:$0xff]   ;;  %v1322_v32 = vld [vmem:[%s1655_s6 + $0x38] sm:$0xff]   ;;  %v323_v49 = vsub.s32 2, %v314_v34  ;;  %s1202_s10 = smul.u32 3072, %s1459_s15  ;;  %s907_s15 = scalar_lea.sflag [#allocation4], %s1651_s27 }
  0x66   : > { %510 = vmatprep.subr.bf16.mxu0 %v1292_v7  ;;  %1173 = vmatprep.subr.bf16.mxu1 %v1310_v14  ;;  %v311_v36 = vld [vmem:[%s1831_s2] sm:$0x7]  ;;  %s1693_s9 = scalar_lea.vmem [#allocation7], %s1201_s24  ;;  %s1476_s21 = smov [#allocation7]  }
  0x67   : > { %v1684_v38 = vrot.slane %v311_v36, %v315_v35  ;;  %v1686_v39 = vrot.slane %v311_v36, %v319_v37  ;;  %v1697_v52 = vrot.slane %v311_v36, %v323_v49  ;;  %s925_s11 = sshll.u32 %s1693_s9, 4  ;;  %s1776_s7 = scalar_lea.hbm %s1832_s3, %s1202_s10  ;;  %s1778_s11 = int_to_ptr.vmem [resolvable:$true] %s925_s11 }
  0x68   : > { %s1381_s8 = scalar_lea.vmem %s1778_s11, 3072  ;;  %s1385_s19 = sshll.u32 %s1476_s21, 4  ;;  %s1386_s19 = int_to_ptr.vmem [resolvable:$false] %s1385_s19 }
  0x69   : > { %511 = vmatpush1.bf16.msra.mxu0 %v1294_v8  ;;  %1174 = vmatpush3.bf16.msra.mxu1 %v1310_v14  ;;  %p1382_p4 = scmp.ne.s32.totalorder %s1778_s11, %s1381_s8  ;;  %s1387_s25 = scalar_lea.vmem %s1386_s19, 6144 }
  0x6a   : > { %512 = vmatprep.subr.bf16.mxu0 %v1295_v9  ;;  %1175 = vmatprep.subr.bf16.mxu1 %v1312_v17  ;;  %p1388_p12 = scmp.lt.s32.totalorder %s1778_s11, %s1386_s19  ;;  %p1389_p11 = scmp.lt.s32.totalorder %s1387_s25, %s1381_s8 }
  0x6b   : > { %p1383_p6 = pnand %p1382_p4, %p1595_p10 }
  0x6c   : > { %p1390_p0 = por %p1389_p11, %p1388_p12 }
  0x6d   : > { %513 = vmatpush1.bf16.msra.mxu0 %v1297_v13  ;;  %1176 = vmatpush3.bf16.msra.mxu1 %v1312_v17  ;;  %p1384_p8 = pneg %p1383_p6 }
  0x6e   : > { %514 = vmatprep.subr.bf16.mxu0 %v1298_v15  ;;  %1177 = vmatprep.subr.bf16.mxu1 %v1313_v20 }
  0x6f   : > { %p1391_p5 = pnand %p1390_p0, %p1384_p8 }
  0x71   : > { %515 = vmatpush1.bf16.msra.mxu0 %v1300_v16  ;;  %1178 = vmatpush3.bf16.msra.mxu1 %v1313_v20 }
  0x72   : > { %516 = vmatprep.subr.bf16.mxu0 %v1301_v18  ;;  %1179 = vmatprep.subr.bf16.mxu1 %v1315_v23 }
  0x75   : > { %517 = vmatpush1.bf16.msra.mxu0 %v1303_v19  ;;  %1180 = vmatpush3.bf16.msra.mxu1 %v1315_v23 }
  0x76   : > { %518 = vmatprep.subr.bf16.mxu0 %v1304_v21  ;;  %1181 = vmatprep.subr.bf16.mxu1 %v1316_v24 }
  0x79   : > { %519 = vmatpush1.bf16.msra.mxu0 %v1306_v22  ;;  %1182 = vmatpush3.bf16.msra.mxu1 %v1316_v24 }
  0x7a   : > { %1183 = vmatprep.subr.bf16.mxu1 %v1318_v25 }
  0x7c   : > { %537 = vmatmul.mubr.bf16.vlgmr.msra.gmra.mrb[0].mxu0 %v1308_v11 }
  0x7d   : > { %546 = vmatprep.mubr.bf16.mxu0 %v1475_v0  ;;  %1184 = vmatpush3.bf16.msra.mxu1 %v1318_v25 }
  0x80   : > { %1186 = vmatmul.mubr.bf16.vlgmr.msra.gmra.mrb[0].mxu1 %v1311_v26 }
  0x81   : > { %1189 = vmatprep.mubr.bf16.mxu1 %v1314_v27 }
  0x84   : > { %547 = vmatmul.mubr.bf16.gmra.mrb[4].mxu0 %v1311_v26 }
  0x85   : > { %556 = vmatprep.mubr.bf16.mxu0 %v1475_v0 }
  0x88   : > { %1190 = vmatmul.mubr.bf16.gmra.mrb[4].mxu1 %v1317_v28 }
  0x89   : > { %1193 = vmatprep.mubr.bf16.mxu1 %v1319_v29 }
  0x8c   : > { %557 = vmatmul.mubr.bf16.gmra.mrb[8].mxu0 %v1314_v27 }
  0x8d   : > { %566 = vmatprep.mubr.bf16.mxu0 %v1475_v0 }
  0x90   : > { %1194 = vmatmul.mubr.bf16.gmra.mrb[8].mxu1 %v1320_v30 }
  0x91   : > { %1197 = vmatprep.mubr.bf16.mxu1 %v1321_v31 }
  0x94   : > { %567 = vmatmul.mubr.bf16.gmra.mrb[12].mxu0 %v1317_v28 }
  0x95   : > { %576 = vmatprep.mubr.bf16.mxu0 %v1475_v0 }
  0x98   : > { %1198 = vmatmul.mubr.bf16.gmra.mrb[12].mxu1 %v1322_v32 }
  0x9c   : > { %577 = vmatmul.mubr.bf16.gmra.mrb[16].mxu0 %v1319_v29 }
  0x9d   : > { %586 = vmatprep.mubr.bf16.mxu0 %v1475_v0 }
  0xa4   : > { %587 = vmatmul.mubr.bf16.gmra.mrb[20].mxu0 %v1320_v30 }
  0xa5   : > { %596 = vmatprep.mubr.bf16.mxu0 %v1475_v0 }
  0xac   : > { %597 = vmatmul.mubr.bf16.gmra.mrb[24].mxu0 %v1321_v31 }
  0xad   : > { %606 = vmatprep.mubr.bf16.mxu0 %v1475_v0 }
  0xb4   : > { %607 = vmatmul.mubr.bf16.gmra.mrb[28].mxu0 %v1322_v32 }
 0x14f   : > { %v538_v40 = vpop.f32.mrb[0].mxu0 }
 0x150   : > { %v539_v41 = vadd.f32 %v538_v40, %v1684_v38  ;;  %v540_v42 = vpop.f32.mrb[1].mxu0 }
 0x151   : > { %v541_v43 = vadd.f32 %v540_v42, %v1686_v39  ;;  %v542_v44 = vpop.f32.mrb[2].mxu0 }
 0x152   : > { %v543_v45 = vadd.f32 %v542_v44, %v1684_v38  ;;  %v544_v46 = vpop.f32.mrb[3].mxu0 }
 0x153   : > { %v1121_v47 = vpack.c.bf16 %v541_v43, %v539_v41  ;;  %v545_v48 = vadd.f32 %v544_v46, %v1686_v39  ;;  %v1187_v59 = vpop.f32.mrb[0].mxu1 }
 0x154   : > { %v660_v62 = vadd.f32 %v1187_v59, %v1697_v52  ;;  %v651_v63 = vpop.f32.mrb[1].mxu1 }
 0x155   : > { %874 = vst [vmem:[%s1693_s9] sm:$0xff] %v1121_v47  ;;  %v1123_v50 = vpack.c.bf16 %v545_v48, %v543_v45  ;;  %v652_v0 = vadd.f32 %v651_v63, %v1697_v52  ;;  %v1188_v1 = vpop.f32.mrb[2].mxu1 }
 0x156   : > { %v1126_v3 = vpack.c.bf16 %v660_v62, %v660_v62  ;;  %v663_v4 = vadd.f32 %v1188_v1, %v1697_v52  ;;  %v654_v5 = vpop.f32.mrb[3].mxu1 }
 0x157   : > { %876 = vst [vmem:[%s1693_s9 + $0xc] sm:$0xff] %v1123_v50  ;;  %v548_v51 = vpop.f32.mrb[4].mxu0  ;;  %v1122_v6 = vpack.c.bf16 %v652_v0, %v652_v0  ;;  %v655_v7 = vadd.f32 %v654_v5, %v1697_v52 }
 0x158   : > { %v549_v53 = vadd.f32 %v548_v51, %v1684_v38  ;;  %v550_v54 = vpop.f32.mrb[5].mxu0  ;;  %879 = vst [vmem:[%s1693_s9 + $0x20] sm:$0xf] %v1126_v3  ;;  %v1128_v9 = vpack.c.bf16 %v663_v4, %v663_v4 }
 0x159   : > { %v551_v55 = vadd.f32 %v550_v54, %v1686_v39  ;;  %v552_v56 = vpop.f32.mrb[6].mxu0  ;;  %875 = vst [vmem:[%s1693_s9 + $0x8] sm:$0xf] %v1122_v6  ;;  %v1124_v12 = vpack.c.bf16 %v655_v7, %v655_v7 }
 0x15a   : > { %v553_v57 = vadd.f32 %v552_v56, %v1684_v38  ;;  %v554_v58 = vpop.f32.mrb[7].mxu0  ;;  %881 = vst [vmem:[%s1693_s9 + $0x2c] sm:$0xf] %v1128_v9 }
 0x15b   : > { %v1125_v60 = vpack.c.bf16 %v551_v55, %v549_v53  ;;  %v555_v61 = vadd.f32 %v554_v58, %v1686_v39  ;;  %877 = vst [vmem:[%s1693_s9 + $0x14] sm:$0xf] %v1124_v12  ;;  %v1191_v17 = vpop.f32.mrb[4].mxu1 }
 0x15c   : > { %v676_v20 = vadd.f32 %v1191_v17, %v1697_v52  ;;  %v667_v21 = vpop.f32.mrb[5].mxu1 }
 0x15d   : > { %878 = vst [vmem:[%s1693_s9 + $0x18] sm:$0xff] %v1125_v60  ;;  %v1127_v2 = vpack.c.bf16 %v555_v61, %v553_v57  ;;  %v668_v22 = vadd.f32 %v667_v21, %v1697_v52  ;;  %v1192_v23 = vpop.f32.mrb[6].mxu1 }
 0x15e   : > { %v1134_v25 = vpack.c.bf16 %v676_v20, %v676_v20  ;;  %v679_v26 = vadd.f32 %v1192_v23, %v1697_v52  ;;  %v670_v27 = vpop.f32.mrb[7].mxu1 }
 0x15f   : > { %880 = vst [vmem:[%s1693_s9 + $0x24] sm:$0xff] %v1127_v2  ;;  %v558_v8 = vpop.f32.mrb[8].mxu0  ;;  %v1130_v28 = vpack.c.bf16 %v668_v22, %v668_v22  ;;  %v671_v29 = vadd.f32 %v670_v27, %v1697_v52 }
 0x160   : > { %v559_v10 = vadd.f32 %v558_v8, %v1684_v38  ;;  %v560_v11 = vpop.f32.mrb[9].mxu0  ;;  %887 = vst [vmem:[%s1693_s9 + $0x50] sm:$0xf] %v1134_v25  ;;  %v1136_v31 = vpack.c.bf16 %v679_v26, %v679_v26 }
 0x161   : > { %v561_v13 = vadd.f32 %v560_v11, %v1686_v39  ;;  %v562_v14 = vpop.f32.mrb[10].mxu0  ;;  %883 = vst [vmem:[%s1693_s9 + $0x38] sm:$0xf] %v1130_v28  ;;  %v1132_v34 = vpack.c.bf16 %v671_v29, %v671_v29 }
 0x162   : > { %v563_v15 = vadd.f32 %v562_v14, %v1684_v38  ;;  %v564_v16 = vpop.f32.mrb[11].mxu0  ;;  %889 = vst [vmem:[%s1693_s9 + $0x5c] sm:$0xf] %v1136_v31 }
 0x163   : > { %v1129_v18 = vpack.c.bf16 %v561_v13, %v559_v10  ;;  %v565_v19 = vadd.f32 %v564_v16, %v1686_v39  ;;  %885 = vst [vmem:[%s1693_s9 + $0x44] sm:$0xf] %v1132_v34  ;;  %v1195_v41 = vpop.f32.mrb[8].mxu1 }
 0x164   : > { %v692_v44 = vadd.f32 %v1195_v41, %v1697_v52  ;;  %v683_v45 = vpop.f32.mrb[9].mxu1 }
 0x165   : > { %882 = vst [vmem:[%s1693_s9 + $0x30] sm:$0xff] %v1129_v18  ;;  %v1131_v24 = vpack.c.bf16 %v565_v19, %v563_v15  ;;  %v684_v46 = vadd.f32 %v683_v45, %v1697_v52  ;;  %v1196_v47 = vpop.f32.mrb[10].mxu1 }
 0x166   : > { %v1142_v49 = vpack.c.bf16 %v692_v44, %v692_v44  ;;  %v695_v50 = vadd.f32 %v1196_v47, %v1697_v52  ;;  %v686_v51 = vpop.f32.mrb[11].mxu1 }
 0x167   : > { %884 = vst [vmem:[%s1693_s9 + $0x3c] sm:$0xff] %v1131_v24  ;;  %v568_v30 = vpop.f32.mrb[12].mxu0  ;;  %v1138_v53 = vpack.c.bf16 %v684_v46, %v684_v46  ;;  %v687_v54 = vadd.f32 %v686_v51, %v1697_v52 }
 0x168   : > { %v569_v32 = vadd.f32 %v568_v30, %v1684_v38  ;;  %v570_v33 = vpop.f32.mrb[13].mxu0  ;;  %895 = vst [vmem:[%s1693_s9 + $0x80] sm:$0xf] %v1142_v49  ;;  %v1144_v56 = vpack.c.bf16 %v695_v50, %v695_v50 }
 0x169   : > { %v571_v35 = vadd.f32 %v570_v33, %v1686_v39  ;;  %v572_v36 = vpop.f32.mrb[14].mxu0  ;;  %891 = vst [vmem:[%s1693_s9 + $0x68] sm:$0xf] %v1138_v53  ;;  %v1140_v59 = vpack.c.bf16 %v687_v54, %v687_v54 }
 0x16a   : > { %v573_v37 = vadd.f32 %v572_v36, %v1684_v38  ;;  %v574_v40 = vpop.f32.mrb[15].mxu0  ;;  %897 = vst [vmem:[%s1693_s9 + $0x8c] sm:$0xf] %v1144_v56 }
 0x16b   : > { %v1133_v42 = vpack.c.bf16 %v571_v35, %v569_v32  ;;  %v575_v43 = vadd.f32 %v574_v40, %v1686_v39  ;;  %893 = vst [vmem:[%s1693_s9 + $0x74] sm:$0xf] %v1140_v59  ;;  %v1199_v0 = vpop.f32.mrb[12].mxu1 }
 0x16c   : > { %v708_v3 = vadd.f32 %v1199_v0, %v1697_v52  ;;  %v699_v4 = vpop.f32.mrb[13].mxu1 }
 0x16d   : > { %886 = vst [vmem:[%s1693_s9 + $0x48] sm:$0xff] %v1133_v42  ;;  %v1135_v48 = vpack.c.bf16 %v575_v43, %v573_v37  ;;  %v700_v5 = vadd.f32 %v699_v4, %v1697_v52  ;;  %v1200_v6 = vpop.f32.mrb[14].mxu1 }
 0x16e   : > { %v1150_v8 = vpack.c.bf16 %v708_v3, %v708_v3  ;;  %v711_v9 = vadd.f32 %v1200_v6, %v1697_v52  ;;  %v702_v10 = vpop.f32.mrb[15].mxu1 }
 0x16f   : > { %888 = vst [vmem:[%s1693_s9 + $0x54] sm:$0xff] %v1135_v48  ;;  %v578_v55 = vpop.f32.mrb[16].mxu0  ;;  %v1146_v11 = vpack.c.bf16 %v700_v5, %v700_v5  ;;  %v703_v12 = vadd.f32 %v702_v10, %v1697_v52 }
 0x170   : > { %v579_v57 = vadd.f32 %v578_v55, %v1684_v38  ;;  %v580_v58 = vpop.f32.mrb[17].mxu0  ;;  %903 = vst [vmem:[%s1693_s9 + $0xb0] sm:$0xf] %v1150_v8  ;;  %v1152_v14 = vpack.c.bf16 %v711_v9, %v711_v9 }
 0x171   : > { %v581_v60 = vadd.f32 %v580_v58, %v1686_v39  ;;  %v582_v61 = vpop.f32.mrb[18].mxu0  ;;  %899 = vst [vmem:[%s1693_s9 + $0x98] sm:$0xf] %v1146_v11  ;;  %v1148_v17 = vpack.c.bf16 %v703_v12, %v703_v12 }
 0x172   : > { %v583_v62 = vadd.f32 %v582_v61, %v1684_v38  ;;  %v584_v63 = vpop.f32.mrb[19].mxu0  ;;  %905 = vst [vmem:[%s1693_s9 + $0xbc] sm:$0xf] %v1152_v14 }
 0x173   : > { %v1137_v1 = vpack.c.bf16 %v581_v60, %v579_v57  ;;  %v585_v2 = vadd.f32 %v584_v63, %v1686_v39  ;;  %901 = vst [vmem:[%s1693_s9 + $0xa4] sm:$0xf] %v1148_v17 }
 0x175   : > { %890 = vst [vmem:[%s1693_s9 + $0x60] sm:$0xff] %v1137_v1  ;;  %v1139_v7 = vpack.c.bf16 %v585_v2, %v583_v62 }
 0x177   : > { %892 = vst [vmem:[%s1693_s9 + $0x6c] sm:$0xff] %v1139_v7  ;;  %v588_v13 = vpop.f32.mrb[20].mxu0 }
 0x178   : > { %v589_v15 = vadd.f32 %v588_v13, %v1684_v38  ;;  %v590_v16 = vpop.f32.mrb[21].mxu0 }
 0x179   : > { %v591_v18 = vadd.f32 %v590_v16, %v1686_v39  ;;  %v592_v19 = vpop.f32.mrb[22].mxu0 }
 0x17a   : > { %v593_v20 = vadd.f32 %v592_v19, %v1684_v38  ;;  %v594_v21 = vpop.f32.mrb[23].mxu0 }
 0x17b   : > { %v1141_v52 = vpack.c.bf16 %v591_v18, %v589_v15  ;;  %v595_v22 = vadd.f32 %v594_v21, %v1686_v39 }
 0x17d   : > { %894 = vst [vmem:[%s1693_s9 + $0x78] sm:$0xff] %v1141_v52  ;;  %v1143_v23 = vpack.c.bf16 %v595_v22, %v593_v20 }
 0x17f   : > { %896 = vst [vmem:[%s1693_s9 + $0x84] sm:$0xff] %v1143_v23  ;;  %v598_v24 = vpop.f32.mrb[24].mxu0 }
 0x180   : > { %v599_v25 = vadd.f32 %v598_v24, %v1684_v38  ;;  %v600_v26 = vpop.f32.mrb[25].mxu0 }
 0x181   : > { %v601_v27 = vadd.f32 %v600_v26, %v1686_v39  ;;  %v602_v28 = vpop.f32.mrb[26].mxu0 }
 0x182   : > { %v603_v29 = vadd.f32 %v602_v28, %v1684_v38  ;;  %v604_v30 = vpop.f32.mrb[27].mxu0 }
 0x183   : > { %v1145_v31 = vpack.c.bf16 %v601_v27, %v599_v25  ;;  %v605_v32 = vadd.f32 %v604_v30, %v1686_v39 }
 0x185   : > { %898 = vst [vmem:[%s1693_s9 + $0x90] sm:$0xff] %v1145_v31  ;;  %v1147_v33 = vpack.c.bf16 %v605_v32, %v603_v29 }
 0x187   : > { %900 = vst [vmem:[%s1693_s9 + $0x9c] sm:$0xff] %v1147_v33  ;;  %v608_v34 = vpop.f32.mrb[28].mxu0 }
 0x188   : > { %v609_v35 = vadd.f32 %v608_v34, %v1684_v38  ;;  %v610_v36 = vpop.f32.mrb[29].mxu0 }
 0x189   : > { %v611_v37 = vadd.f32 %v610_v36, %v1686_v39  ;;  %v612_v40 = vpop.f32.mrb[30].mxu0 }
 0x18a   : > { %v613_v41 = vadd.f32 %v612_v40, %v1684_v38  ;;  %v614_v42 = vpop.f32.mrb[31].mxu0 }
 0x18b   : > { %v1149_v43 = vpack.c.bf16 %v611_v37, %v609_v35  ;;  %v615_v44 = vadd.f32 %v614_v42, %v1686_v39 }
 0x18d   : > { %902 = vst [vmem:[%s1693_s9 + $0xa8] sm:$0xff] %v1149_v43  ;;  %v1151_v45 = vpack.c.bf16 %v615_v44, %v613_v41 }
 0x18f   : > { %904 = vst [vmem:[%s1693_s9 + $0xb4] sm:$0xff] %v1151_v45 }
 0x190   : > { %1394 = shalt.err (!%p1391_p5)
}
 0x191   : > { %s1395_s29 = scalar_lea.hbm %s1776_s7, 3072  ;;  %s1399_s20 = scalar_lea.hbm %s1832_s3, 6144 }
 0x192   : > { %p1396_p9 = scmp.ne.s32.totalorder %s1776_s7, %s1395_s29  ;;  %p1400_p3 = scmp.lt.u32.totalorder %s1776_s7, %s1832_s3 }
 0x193   : > { %p1401_p7 = scmp.lt.u32.totalorder %s1399_s20, %s1395_s29  ;;  %p1403_p4 = scmp.lt.u32.totalorder %s1395_s29, %s1776_s7 }
 0x194   : > { %p1397_p1 = pnand %p1396_p9, %p1595_p10 }
 0x195   : > { %p1402_p13 = por %p1401_p7, %p1400_p3 }
 0x196   : > { %p1398_p2 = pneg %p1397_p1 }
 0x197   : > { %p1404_p6 = por %p1403_p4, %p1402_p13 }
 0x199   : > { %p1405_p8 = pnand %p1404_p6, %p1398_p2 }
 0x19b   : > { %1408 = shalt.err (!%p1405_p8)
}
 0x19c   : > { %s1477_s9 = smov 192   ;;  %s1478_s10 = smov 12  }
 0x19d   : > { %1209 = dma.vmem_to_hbm [thread:$0]  (%p1595_p10), %s1778_s11, 3072, %s1776_s7, %s907_s15, %s1477_s9, %s1477_s9, %s1478_s10  }
 0x19e PF: > { %s940_s18 = sand.u32 1, %s1447_s12   ;;  %p1850_p12 = scmp.ne.s32.totalorder %s1840_s23, 0 }
 0x19f   : > { %p1851_p11 = scmp.ge.s32.totalorder %s1467_s17, 2  ;;  %s941_s26 = scalar_lea.sflag [#allocation4], %s940_s18 }
 0x1a1   : > { %p1220_p0 = pnand %p1851_p11, %p1850_p12 }
 0x1a3   : > { %1442 = dma.done.wait (!%p1220_p0), %s941_s26, 3072  }
 0x1a4   : > { %1444 = vsyncadd (!%p1220_p0), %s941_s26, 4294964224  ;;  %s20_s17 = sadd.s32 1, %s1467_s17   ;;  %s1852_s12 = smov %s1451_s13 }
 0x1a5   : > { %p17_p5 = scmp.ge.s32.totalorder %s20_s17, 4   ;;  %s1853_s13 = smov %s1455_s14 }
 0x1a6   : > { %s1854_s14 = smov %s1604_s5  ;;  %s1855_s15 = smov %s1463_s16 }
 0x1a7   : > { %s1856_s16 = smov %s1858_s28  ;;  %19 = sbr.rel (!%p17_p5) target bundleno = 7 (0x7), region = 85 }
 0x1ae   :  { %946 = vsyncpa [#allocation3], 1 }
 0x1af   :  { %948 = vsyncpa [#allocation3 + $0x1], 1 }
 0x1b0   :  { %949 = vsyncpa [#allocation6], 1 }
 0x1b1   :  { %950 = vsyncpa [#allocation4], 1 }
 0x1b2   :  { %952 = vsyncpa [#allocation4 + $0x1], 1 }

</bundles_post_ra>
